<compile_context>
chip_gen: v6e
topology: v6e:2x2x1
jax: 0.10.0
libtpu: 0.0.40
codegen_flags: <defaults>
</compile_context>

<pallas_src>
import jax
import jax.numpy as jnp
from jax.experimental import pallas as pl
from jax.experimental.pallas import tpu as pltpu


def _round_up(v, m):
    return (v + m - 1) // m * m


def upsample_matrix_linear_align_corners(l_in, l_out, dtype=jnp.float32):
    """U such that (x @ U) == 1-D linear upsample with align_corners=True."""
    j = jnp.arange(l_out, dtype=jnp.float32)
    src = j * (l_in - 1) / (l_out - 1)
    i0f = jnp.clip(jnp.floor(src), 0, l_in - 2)
    frac = src - i0f
    i0 = i0f.astype(jnp.int32)
    rows = jnp.arange(l_in, dtype=jnp.int32)[:, None]
    u = (jnp.where(rows == i0[None, :], 1.0 - frac[None, :], 0.0)
         + jnp.where(rows == i0[None, :] + 1, frac[None, :], 0.0))
    return u.astype(dtype)


def _make_kernel(num_blocks, l2, l2_pad, matmul_dtype):
    def kernel(x_ref, up_ref, *args):
        out_ref = args[-1]
        wb_refs = args[:-1]

        # Per-sequence boundary masks, computed in-kernel (no extra DMA inputs).
        # m_prev zeroes the left boundary (and the lane-pad region), m_next the right.
        pos = jax.lax.broadcasted_iota(jnp.int32, (1, l2_pad), 1)
        m_prev = ((pos >= 1) & (pos < l2)).astype(jnp.float32)
        m_next = (pos < l2 - 1).astype(jnp.float32)

        # Upsample: one MXU matmul against the shared (L_pad, L2_pad) matrix.
        x = x_ref[0].astype(matmul_dtype)            # (C_in_pad, L_pad)
        up = up_ref[...].astype(matmul_dtype)        # (L_pad, L2_pad)
        h = jnp.dot(x, up, preferred_element_type=jnp.float32)   # (C_in_pad, L2_pad) f32

        # ConvBlock1D stack: Conv1d(k=3, pad=1) + bias + ReLU.
        for i in range(num_blocks):
            w = wb_refs[2 * i][...].astype(matmul_dtype)   # (3*Co_pad, Ci_pad) taps stacked
            b = wb_refs[2 * i + 1][...]                    # (Co_pad, 1) f32
            co = w.shape[0] // 3

            # One matmul for all three taps; neighbours recovered on the OUTPUT via XLU
            # rolls + boundary masks (no shifted input copies, no concatenates).
            y_all = jnp.dot(w, h.astype(matmul_dtype),
                            preferred_element_type=jnp.float32)  # (3*Co_pad, L2_pad)
            y_prev = pltpu.roll(y_all[0 * co:1 * co], shift=1, axis=1)            # h[l-1] tap
            y_mid = y_all[1 * co:2 * co]                                          # h[l]   tap
            y_next = pltpu.roll(y_all[2 * co:3 * co], shift=l2_pad - 1, axis=1)   # h[l+1] tap

            y = m_prev * y_prev + y_mid + m_next * y_next + b
            h = jnp.maximum(y, 0.0)   # ReLU (f32 elementwise; safe on v5e)

        out_ref[0] = h.astype(out_ref.dtype)

    return kernel


def _pad_and_stack_params(params):
    """PyTorch-layout (C_out, C_in, 3) -> taps stacked along the output-channel axis:
       weight (3*C_out_pad, C_in_pad), bias (C_out_pad, 1); zero-padded, f32."""
    out = []
    for (w, b) in params:
        co, ci, _ = w.shape
        co_pad = _round_up(co, 8)
        ci_pad = _round_up(ci, 8)
        ws = jnp.zeros((3 * co_pad, ci_pad), jnp.float32)
        for t in range(3):   # tap t multiplies the (l - 1 + t) input sample
            ws = ws.at[t * co_pad:t * co_pad + co, :ci].set(w[:, :, t].astype(jnp.float32))
        bs = jnp.zeros((co_pad, 1), jnp.float32).at[:co, 0].set(b.astype(jnp.float32))
        out.append((ws, bs))
    return out


def out_layer_pallas(x, params, matmul_dtype=jnp.float32):
    n, c_in, l = x.shape
    l2 = 2 * l
    c_in_pad = _round_up(c_in, 8)
    c_out = params[-1][0].shape[0]
    c_out_pad = _round_up(c_out, 8)
    l_in_pad = _round_up(l, 128)     # lane-dense input tile
    l2_pad = _round_up(l2, 128)      # lane-dense activations & output store

    # Host-side layout plumbing (cheap XLA ops): channels padded to a sublane tile,
    # spatial padded to a lane tile; padded rows/cols carry exact zeros.
    x_p = jnp.zeros((n, c_in_pad, l_in_pad), jnp.float32).at[:, :c_in, :l].set(
        x.astype(jnp.float32))

    # Upsample matrix kept in f32 regardless of input dtype (interpolation fractions).
    up = upsample_matrix_linear_align_corners(l, l2, jnp.float32)
    up_p = jnp.zeros((l_in_pad, l2_pad), jnp.float32).at[:l, :l2].set(up)

    fused = _pad_and_stack_params(params)
    wb_flat, wb_specs = [], []
    for (ws, bs) in fused:
        wb_flat += [ws, bs]
        wb_specs += [pl.BlockSpec(ws.shape, lambda i: (0, 0)),
                     pl.BlockSpec(bs.shape, lambda i: (0, 0))]

    # Advisory cost estimate for the XLA scheduler.
    flops = n * (2 * c_in_pad * l_in_pad * l2_pad
                 + sum(2 * ws.shape[0] * ws.shape[1] * l2_pad for ws, _ in fused))
    bytes_accessed = 4 * (x_p.size + up_p.size + sum(int(a.size) for a in wb_flat)
                          + n * c_out_pad * l2_pad)

    grid_spec = pltpu.PrefetchScalarGridSpec(
        num_scalar_prefetch=0,
        grid=(n,),   # one batch per step; independent steps -> both TCs on v7x
        in_specs=[pl.BlockSpec((1, c_in_pad, l_in_pad), lambda i: (i, 0, 0)),
                  pl.BlockSpec(up_p.shape, lambda i: (0, 0))] + wb_specs,
        out_specs=pl.BlockSpec((1, c_out_pad, l2_pad), lambda i: (i, 0, 0)),
    )

    out_p = pl.pallas_call(
        _make_kernel(len(fused), l2, l2_pad, matmul_dtype),
        out_shape=jax.ShapeDtypeStruct((n, c_out_pad, l2_pad), jnp.float32),
        grid_spec=grid_spec,
        compiler_params=pltpu.CompilerParams(dimension_semantics=("parallel",)),
        cost_estimate=pl.CostEstimate(flops=int(flops), transcendentals=0,
                                      bytes_accessed=int(bytes_accessed)),
    )(x_p, up_p, *wb_flat)

    # (N, C_out_pad, L2_pad) -> (N, C_out, 2L)
    return out_p[:, :c_out, :l2].astype(x.dtype)


def init_params(key, in_channels, out_channels, num_convblocks, dtype=jnp.float32):
    """Deterministic Conv1d weight/bias init, PyTorch layout (C_out, C_in, 3)."""
    assert num_convblocks >= 2
    chan_pairs = ([(in_channels, in_channels)] * (num_convblocks - 2)
                  + [(in_channels, out_channels)])
    params = []
    for ci, co in chan_pairs:
        key, kw, kb = jax.random.split(key, 3)
        bound = 1.0 / float(ci * 3) ** 0.5
        w = jax.random.uniform(kw, (co, ci, 3), dtype, -bound, bound)
        b = jax.random.uniform(kb, (co,), dtype, -bound, bound)
        params.append((w, b))
    return params


def out_layer_reference(x, params):
    """Pure-JAX reference (upsample matrix + lax.conv_general_dilated)."""
    n, c_in, l = x.shape
    l2 = 2 * l
    up = upsample_matrix_linear_align_corners(l, l2, jnp.float32)
    h = jnp.einsum('ncl,lm->ncm', x.astype(jnp.float32), up)
    for (w, b) in params:
        y = jax.lax.conv_general_dilated(
            h, w.astype(jnp.float32), window_strides=(1,), padding=[(1, 1)],
            dimension_numbers=('NCH', 'OIH', 'NCH'))
        y = y + b.astype(jnp.float32)[None, :, None]
        h = jnp.maximum(y, 0.0)
    return h.astype(x.dtype)


if __name__ == "__main__":
    key = jax.random.PRNGKey(0)
    kx, kp = jax.random.split(key)

    # Small shapes consistent with the module: batch=2, in_channels=4, length=16.
    N, C_IN, L = 2, 4, 16
    C_OUT, NUM_CONVBLOCKS = 8, 3

    x = jax.random.normal(kx, (N, C_IN, L), jnp.float32)
    params = init_params(kp, C_IN, C_OUT, NUM_CONVBLOCKS, jnp.float32)

    out = out_layer_pallas(x, params)
    out = jax.block_until_ready(out)

    ref = out_layer_reference(x, params)
    assert out.shape == (N, C_OUT, 2 * L), out.shape
    assert jnp.allclose(out, ref, rtol=1e-4, atol=1e-4), \
        float(jnp.max(jnp.abs(out - ref)))

    print("KERNEL_OK")
</pallas_src>

<mosaic_0001>
module attributes {stable_mosaic.version = 11 : i64} {
  func.func @kernel(%arg0: i32, %arg1: memref<1x8x128xf32, #tpu.memory_space<vmem>>, %arg2: memref<128x128xf32, #tpu.memory_space<vmem>>, %arg3: memref<24x8xf32, #tpu.memory_space<vmem>>, %arg4: memref<8x1xf32, #tpu.memory_space<vmem>>, %arg5: memref<24x8xf32, #tpu.memory_space<vmem>>, %arg6: memref<8x1xf32, #tpu.memory_space<vmem>>, %arg7: memref<1x8x128xf32, #tpu.memory_space<vmem>>) attributes {dimension_semantics = [#tpu.dimension_semantics<parallel>], iteration_bounds = array<i64: 2>, scalar_prefetch = 0 : i64, scratch_operands = 0 : i64, tpu.core_type = #tpu.core_type<tc>, window_params = [{transform_indices = @transform_0, window_bounds = array<i64: 1, 8, 128>}, {pipeline_mode = #tpu.pipeline_mode<synchronous>, transform_indices = @transform_1, window_bounds = array<i64: 128, 128>}, {pipeline_mode = #tpu.pipeline_mode<synchronous>, transform_indices = @transform_2, window_bounds = array<i64: 24, 8>}, {pipeline_mode = #tpu.pipeline_mode<synchronous>, transform_indices = @transform_3, window_bounds = array<i64: 8, 1>}, {pipeline_mode = #tpu.pipeline_mode<synchronous>, transform_indices = @transform_4, window_bounds = array<i64: 24, 8>}, {pipeline_mode = #tpu.pipeline_mode<synchronous>, transform_indices = @transform_5, window_bounds = array<i64: 8, 1>}, {transform_indices = @transform_6, window_bounds = array<i64: 1, 8, 128>}]} {
    %0 = tpu.iota {dimensions = array<i32: 1>} : vector<1x128xi32>
    %c1_i32 = arith.constant 1 : i32
    %1 = vector.broadcast %c1_i32 : i32 to vector<1x128xi32>
    %2 = arith.cmpi sge, %0, %1 : vector<1x128xi32>
    %c32_i32 = arith.constant 32 : i32
    %3 = vector.broadcast %c32_i32 : i32 to vector<1x128xi32>
    %4 = arith.cmpi slt, %0, %3 : vector<1x128xi32>
    %5 = arith.andi %2, %4 : vector<1x128xi1>
    %6 = arith.extui %5 : vector<1x128xi1> to vector<1x128xi32>
    %7 = arith.sitofp %6 : vector<1x128xi32> to vector<1x128xf32>
    %c31_i32 = arith.constant 31 : i32
    %8 = vector.broadcast %c31_i32 : i32 to vector<1x128xi32>
    %9 = arith.cmpi slt, %0, %8 : vector<1x128xi32>
    %10 = arith.extui %9 : vector<1x128xi1> to vector<1x128xi32>
    %11 = arith.sitofp %10 : vector<1x128xi32> to vector<1x128xf32>
    %c0 = arith.constant 0 : index
    %c0_0 = arith.constant 0 : index
    %c0_1 = arith.constant 0 : index
    %12 = vector.load %arg1[%c0, %c0_0, %c0_1] : memref<1x8x128xf32, #tpu.memory_space<vmem>>, vector<1x8x128xf32>
    %13 = vector.shape_cast %12 : vector<1x8x128xf32> to vector<8x128xf32>
    %c0_2 = arith.constant 0 : index
    %c0_3 = arith.constant 0 : index
    %14 = vector.load %arg2[%c0_2, %c0_3] : memref<128x128xf32, #tpu.memory_space<vmem>>, vector<128x128xf32>
    %cst = arith.constant dense<0.000000e+00> : vector<8x128xf32>
    %15 = tpu.matmul %13, %14, %cst {dimension_numbers = #tpu.dot_dimension_numbers<[1], [0], [0], [1], [0, 0, 1, 1], [], []>} : vector<8x128xf32>, vector<128x128xf32>, vector<8x128xf32> -> vector<8x128xf32>
    %c0_4 = arith.constant 0 : index
    %c0_5 = arith.constant 0 : index
    %16 = vector.load %arg3[%c0_4, %c0_5] : memref<24x8xf32, #tpu.memory_space<vmem>>, vector<24x8xf32>
    %c0_6 = arith.constant 0 : index
    %c0_7 = arith.constant 0 : index
    %17 = vector.load %arg4[%c0_6, %c0_7] : memref<8x1xf32, #tpu.memory_space<vmem>>, vector<8x1xf32>
    %cst_8 = arith.constant dense<0.000000e+00> : vector<24x128xf32>
    %18 = tpu.matmul %16, %15, %cst_8 {dimension_numbers = #tpu.dot_dimension_numbers<[1], [0], [0], [1], [0, 0, 1, 1], [], []>} : vector<24x8xf32>, vector<8x128xf32>, vector<24x128xf32> -> vector<24x128xf32>
    %19 = vector.extract_strided_slice %18 {offsets = [0, 0], sizes = [8, 128], strides = [1, 1]} : vector<24x128xf32> to vector<8x128xf32>
    %c1_i32_9 = arith.constant 1 : i32
    %20 = tpu.dynamic_rotate %19 by %c1_i32_9 dim 1 : vector<8x128xf32>, i32 -> vector<8x128xf32>
    %21 = vector.extract_strided_slice %18 {offsets = [8, 0], sizes = [8, 128], strides = [1, 1]} : vector<24x128xf32> to vector<8x128xf32>
    %22 = vector.extract_strided_slice %18 {offsets = [16, 0], sizes = [8, 128], strides = [1, 1]} : vector<24x128xf32> to vector<8x128xf32>
    %c127_i32 = arith.constant 127 : i32
    %23 = tpu.dynamic_rotate %22 by %c127_i32 dim 1 : vector<8x128xf32>, i32 -> vector<8x128xf32>
    %24 = vector.broadcast %7 : vector<1x128xf32> to vector<8x128xf32>
    %25 = arith.mulf %24, %20 : vector<8x128xf32>
    %26 = arith.addf %25, %21 : vector<8x128xf32>
    %27 = vector.broadcast %11 : vector<1x128xf32> to vector<8x128xf32>
    %28 = arith.mulf %27, %23 : vector<8x128xf32>
    %29 = arith.addf %26, %28 : vector<8x128xf32>
    %30 = vector.broadcast %17 : vector<8x1xf32> to vector<8x128xf32>
    %31 = arith.addf %29, %30 : vector<8x128xf32>
    %cst_10 = arith.constant 0.000000e+00 : f32
    %32 = vector.broadcast %cst_10 : f32 to vector<8x128xf32>
    %33 = arith.maximumf %31, %32 : vector<8x128xf32>
    %c0_11 = arith.constant 0 : index
    %c0_12 = arith.constant 0 : index
    %34 = vector.load %arg5[%c0_11, %c0_12] : memref<24x8xf32, #tpu.memory_space<vmem>>, vector<24x8xf32>
    %c0_13 = arith.constant 0 : index
    %c0_14 = arith.constant 0 : index
    %35 = vector.load %arg6[%c0_13, %c0_14] : memref<8x1xf32, #tpu.memory_space<vmem>>, vector<8x1xf32>
    %cst_15 = arith.constant dense<0.000000e+00> : vector<24x128xf32>
    %36 = tpu.matmul %34, %33, %cst_15 {dimension_numbers = #tpu.dot_dimension_numbers<[1], [0], [0], [1], [0, 0, 1, 1], [], []>} : vector<24x8xf32>, vector<8x128xf32>, vector<24x128xf32> -> vector<24x128xf32>
    %37 = vector.extract_strided_slice %36 {offsets = [0, 0], sizes = [8, 128], strides = [1, 1]} : vector<24x128xf32> to vector<8x128xf32>
    %c1_i32_16 = arith.constant 1 : i32
    %38 = tpu.dynamic_rotate %37 by %c1_i32_16 dim 1 : vector<8x128xf32>, i32 -> vector<8x128xf32>
    %39 = vector.extract_strided_slice %36 {offsets = [8, 0], sizes = [8, 128], strides = [1, 1]} : vector<24x128xf32> to vector<8x128xf32>
    %40 = vector.extract_strided_slice %36 {offsets = [16, 0], sizes = [8, 128], strides = [1, 1]} : vector<24x128xf32> to vector<8x128xf32>
    %c127_i32_17 = arith.constant 127 : i32
    %41 = tpu.dynamic_rotate %40 by %c127_i32_17 dim 1 : vector<8x128xf32>, i32 -> vector<8x128xf32>
    %42 = vector.broadcast %7 : vector<1x128xf32> to vector<8x128xf32>
    %43 = arith.mulf %42, %38 : vector<8x128xf32>
    %44 = arith.addf %43, %39 : vector<8x128xf32>
    %45 = vector.broadcast %11 : vector<1x128xf32> to vector<8x128xf32>
    %46 = arith.mulf %45, %41 : vector<8x128xf32>
    %47 = arith.addf %44, %46 : vector<8x128xf32>
    %48 = vector.broadcast %35 : vector<8x1xf32> to vector<8x128xf32>
    %49 = arith.addf %47, %48 : vector<8x128xf32>
    %cst_18 = arith.constant 0.000000e+00 : f32
    %50 = vector.broadcast %cst_18 : f32 to vector<8x128xf32>
    %51 = arith.maximumf %49, %50 : vector<8x128xf32>
    %c0_19 = arith.constant 0 : index
    %c0_20 = arith.constant 0 : index
    %c0_21 = arith.constant 0 : index
    %52 = vector.load %arg7[%c0_19, %c0_20, %c0_21] : memref<1x8x128xf32, #tpu.memory_space<vmem>>, vector<1x8x128xf32>
    %53 = vector.shape_cast %52 : vector<1x8x128xf32> to vector<8x128xf32>
    %54 = vector.shape_cast %51 : vector<8x128xf32> to vector<1x8x128xf32>
    tpu.vector_store %arg7[%c0_19, %c0_20, %c0_21], %54 {strides = array<i32>} : memref<1x8x128xf32, #tpu.memory_space<vmem>>, vector<1x8x128xf32>,
    return
  }
  func.func @transform_0(%arg0: i32) -> (i32, i32, i32) {
    %c0_i32 = arith.constant 0 : i32
    %c0_i32_0 = arith.constant 0 : i32
    %c0_i32_1 = arith.constant 0 : i32
    return %arg0, %c0_i32, %c0_i32_0 : i32, i32, i32
  }
  func.func @transform_1(%arg0: i32) -> (i32, i32) {
    %c0_i32 = arith.constant 0 : i32
    %c0_i32_0 = arith.constant 0 : i32
    %c0_i32_1 = arith.constant 0 : i32
    return %c0_i32, %c0_i32_0 : i32, i32
  }
  func.func @transform_2(%arg0: i32) -> (i32, i32) {
    %c0_i32 = arith.constant 0 : i32
    %c0_i32_0 = arith.constant 0 : i32
    %c0_i32_1 = arith.constant 0 : i32
    return %c0_i32, %c0_i32_0 : i32, i32
  }
  func.func @transform_3(%arg0: i32) -> (i32, i32) {
    %c0_i32 = arith.constant 0 : i32
    %c0_i32_0 = arith.constant 0 : i32
    %c0_i32_1 = arith.constant 0 : i32
    return %c0_i32, %c0_i32_0 : i32, i32
  }
  func.func @transform_4(%arg0: i32) -> (i32, i32) {
    %c0_i32 = arith.constant 0 : i32
    %c0_i32_0 = arith.constant 0 : i32
    %c0_i32_1 = arith.constant 0 : i32
    return %c0_i32, %c0_i32_0 : i32, i32
  }
  func.func @transform_5(%arg0: i32) -> (i32, i32) {
    %c0_i32 = arith.constant 0 : i32
    %c0_i32_0 = arith.constant 0 : i32
    %c0_i32_1 = arith.constant 0 : i32
    return %c0_i32, %c0_i32_0 : i32, i32
  }
  func.func @transform_6(%arg0: i32) -> (i32, i32, i32) {
    %c0_i32 = arith.constant 0 : i32
    %c0_i32_0 = arith.constant 0 : i32
    %c0_i32_1 = arith.constant 0 : i32
    return %arg0, %c0_i32, %c0_i32_0 : i32, i32, i32
  }
}

</mosaic_0001>

<bundles_post_ra>
// kernel: tpu_custom_call.1
= control target key start
LH: loop header
LB: loop body
LE: loop exit
PB: predicated region body
PF: predicated region fallthrough
CT: control target
= control target key end

     0   :  { %11 = vsyncpa [#allocation3], 0  ;;  %s1132_s0 = inlined_call_operand.vmem [shape: f32[2,8,128], index: 0, kind: input, shape index: {}]   ;;  %s1133_s1 = inlined_call_operand.hbm [shape: f32[128,128], index: 1, kind: input, shape index: {}]   ;;  %s1134_s2 = inlined_call_operand.vmem [shape: f32[24,8], index: 2, kind: input, shape index: {}]   ;;  %s1135_s3 = inlined_call_operand.vmem [shape: f32[8,1], index: 3, kind: input, shape index: {}]   ;;  %s1136_s4 = inlined_call_operand.vmem [shape: f32[24,8], index: 4, kind: input, shape index: {}]   ;;  %s1137_s5 = inlined_call_operand.vmem [shape: f32[8,1], index: 5, kind: input, shape index: {}]   ;;  %s1138_s6 = inlined_call_operand.hbm [shape: f32[2,8,128], index: 6, kind: output, shape index: {}]  }
   0x1   :  { %12 = vsyncpa [#allocation4], 0 }
   0x2   :  { %14 = vsyncpa [#allocation4 + $0x1], 0  ;;  %s959_s21 = smov 0   ;;  %s961_s22 = smov 0  }
   0x3   :  { %s963_s23 = smov 0   ;;  %s965_s24 = smov 0  }
   0x4 LB: > { %s980_s25 = sadd.s32 4294967295, %s913_s24   ;;  %s662_s26 = sadd.s32 4294967294, %s913_s24   ;;  %s913_s24 = sphi %s965_s24, %s1146_s24   ;;  %s909_s23 = sphi %s963_s23, %s1145_s23   ;;  %s905_s22 = sphi %s961_s22, %s1144_s22   ;;  %s901_s21 = sphi %s959_s21, %s1143_s21  }
   0x5   : > { %s984_s27 = sadd.s32 1, %s913_s24   ;;  %s158_s28 = sadd.s32 1, %s909_s23 }
   0x6   : > { %s155_s29 = ssub.s32 %s913_s24, %s984_s27  ;;  %p168_p0 = scmp.ne.s32.totalorder %s909_s23, %s905_s22 }
   0x7   : > { %p156_p1 = scmp.eq.s32.totalorder %s155_s29, 0  ;;  %p169_p2 = scmp.eq.s32.totalorder %s980_s25, 1 }
   0x8   : > { %p174_p3 = scmp.ne.s32.totalorder %s905_s22, %s901_s21  ;;  %p175_p4 = scmp.eq.s32.totalorder %s662_s26, 1 }
   0x9   : > { %s995_s30 = scalar_select %p156_p1, %s909_s23, %s158_s28  }
   0xa   : > { %p997_p5 = por %p169_p2, %p168_p0  ;;  %p1001_p6 = por %p175_p4, %p174_p3 }
   0xb   : > { %p663_p7 = scmp.ge.s32.totalorder %s913_s24, 1  ;;  %p182_p8 = scmp.lt.s32.totalorder %s913_s24, 3 }
   0xc   : > { %s1140_s8 = scalar_select %p1001_p6, 1, 0 }
   0xd   : > { %p778_p9 = scmp.eq.s32.totalorder %s980_s25, 0  ;;  %p1008_p10 = pnand %p663_p7, %p182_p8 }
   0xe   : > { %s915_s10 = smov [#allocation2]  }
   0xf   : > { %s194_s11 = sshll.u32 %s915_s10, 4  ;;  %p770_p11 = pneg %p1008_p10  ;;  %s195_s11 = int_to_ptr.vmem [resolvable:$true] %s194_s11 }
  0x10   : > { %s834_s12 = scalar_lea.vmem %s195_s11, 2048  ;;  %p842_p3 = scmp.lt.s32.totalorder %s195_s11, %s195_s11 }
  0x11   : > { %p771_p12 = pnand %p778_p9, %p770_p11  ;;  %p835_p0 = scmp.ne.s32.totalorder %s195_s11, %s834_s12 }
  0x12   : > { %p843_p4 = scmp.lt.s32.totalorder %s834_s12, %s834_s12 }
  0x13   : > { %p825_p13 = pneg %p771_p12 }
  0x14   : > { %p844_p6 = por %p843_p4, %p842_p3 }
  0x15   : > { %p837_p1 = pnand %p835_p0, %p825_p13 }
  0x17   : > { %p838_p2 = pneg %p837_p1 }
  0x19   : > { %p845_p7 = pnand %p844_p6, %p838_p2 }
  0x1b   : > { %848 = shalt.err (!%p845_p7)
}
  0x1c   : > { %s916_s13 = smov 128   ;;  %s917_s14 = smov 8  }
  0x1d   : > { %773 = dma.hbm_to_vmem [thread:$0]  (!%p771_p12), %s1133_s1, 2048, %s195_s11, [#allocation3], %s916_s13, %s916_s13, %s917_s14  }
  0x1e   : > { %229 = sbr.rel (%p1008_p10) target bundleno = 928 (0x3a0), region = 44 }
  0x23   : > { %892 = dma.done.wait (%p778_p9), [#allocation3], 2048  }
  0x24   : > { %894 = vsyncadd (%p778_p9), [#allocation3], 4294965248  ;;  %v918_v0 = vmov 0.0   ;;  %vm919_vm0 = vmmov 0   ;;  %v288_v1 = vld [vmem:[#allocation2 + $0x78] sm:$0xff]  ;;  %v287_v2 = vld [vmem:[#allocation2 + $0x70] sm:$0xff]  ;;  %v262_v31 = vlaneseq }
  0x25   : > { %707 = vmatprep.subr.mxu0 %v918_v0  ;;  %739 = vmatprep.mubr.msk.f32.mxu0 %vm919_vm0, %v918_v0  ;;  %v286_v3 = vld [vmem:[#allocation2 + $0x68] sm:$0xff]  ;;  %v285_v4 = vld [vmem:[#allocation2 + $0x60] sm:$0xff]  ;;  %v284_v5 = vld [vmem:[#allocation2 + $0x58] sm:$0xff]  ;;  %p258_p6 = scmp.lt.s32.totalorder %s980_s25, 1  ;;  %vm363_vm1 = vcmask 64512   ;;  %v920_v23 = vmov 0  }
  0x26   : > { %742 = vmatprep.subr.mxu1 %v918_v0  ;;  %744 = vmatprep.mubr.msk.f32.mxu1 %vm919_vm0, %v918_v0  ;;  %v283_v6 = vld [vmem:[#allocation2 + $0x50] sm:$0xff]  ;;  %v282_v7 = vld [vmem:[#allocation2 + $0x48] sm:$0xff]  ;;  %v281_v8 = vld [vmem:[#allocation2 + $0x40] sm:$0xff]  ;;  %s921_s13 = smov 1   ;;  %s922_s16 = smov 127   ;;  %v263_v32 = vand.u32 127, %v262_v31 }
  0x27   : > { %708 = vmatpush3.msra.mxu0 %v288_v1  ;;  %v280_v9 = vld [vmem:[#allocation2 + $0x38] sm:$0xff]  ;;  %v279_v10 = vld [vmem:[#allocation2 + $0x30] sm:$0xff]  ;;  %v278_v11 = vld [vmem:[#allocation2 + $0x28] sm:$0xff]  ;;  %s259_s17 = scalar_select %p258_p6, %s980_s25, 1  ;;  %821 = vset.pattern.permute.xlu0 %v920_v23 }
  0x28   : > { %709 = vmatprep.subr.mxu0 %v918_v0  ;;  %v277_v12 = vld [vmem:[#allocation2 + $0x20] sm:$0xff]  ;;  %v276_v13 = vld [vmem:[#allocation2 + $0x18] sm:$0xff]  ;;  %v275_v14 = vld [vmem:[#allocation2 + $0x10] sm:$0xff]  ;;  %822 = vset.pattern.permute.xlu1 %v920_v23  ;;  %vm264_vm2 = vcmp.ge.s32.totalorder %v263_v32, 1  ;;  %vm265_vm3 = vcmp.lt.s32.totalorder %v263_v32, 32  ;;  %vm269_vm5 = vcmp.lt.s32.totalorder %v263_v32, 31 }
  0x29   : > { %710 = vmatpush3.msra.mxu0 %v287_v2  ;;  %s669_s18 = sshll.u32 %s259_s17, 3  ;;  %v274_v15 = vld [vmem:[#allocation2 + $0x8] sm:$0xff]  ;;  %v273_v16 = vld [vmem:[#allocation2] sm:$0xff]  ;;  %v361_v22 = vld [vmem:[%s1134_s2 + $0x10] sm:$0xff]  ;;  %v671_v36 = vsel %vm269_vm5, 1.0, %v918_v0  ;;  %s255_s10 = sand.u32 1, %s905_s22  }
  0x2a   : > { %711 = vmatprep.subr.mxu0 %v918_v0  ;;  %s261_s26 = scalar_lea.vmem %s1132_s0, %s669_s18  ;;  %v359_v18 = vld [vmem:[%s1134_s2] sm:$0xff]  ;;  %v360_v21 = vld [vmem:[%s1134_s2 + $0x8] sm:$0xff]  ;;  %vm266_vm4 = vmand %vm264_vm2, %vm265_vm3  ;;  %s668_s11 = sshll.u32 %s255_s10, 3 }
  0x2b   : > { %712 = vmatpush3.msra.mxu0 %v286_v3  ;;  %v272_v17 = vld [vmem:[%s261_s26] sm:$0xff]  ;;  %v670_v33 = vsel %vm266_vm4, 1.0, %v918_v0  ;;  %v469_v45 = vld [vmem:[%s1136_s4 + $0x8] sm:$0xff]  ;;  %v470_v46 = vld [vmem:[%s1136_s4 + $0x10] sm:$0xff]  ;;  %s679_s12 = sshll.u32 %s980_s25, 7  ;;  %s578_s18 = scalar_lea.sflag [#allocation4], %s255_s10 }
  0x2c   : > { %713 = vmatprep.subr.mxu0 %v918_v0  ;;  %v362_v26 = vld [vmem:[%s1135_s3] sm:$0xff]  ;;  %s923_s20 = smov [#allocation5]  }
  0x2d   : > { %714 = vmatpush3.msra.mxu0 %v285_v4  ;;  %v468_v44 = vld [vmem:[%s1136_s4] sm:$0xff]  ;;  %s853_s26 = sshll.u32 %s923_s20, 4  ;;  %s854_s26 = int_to_ptr.vmem [resolvable:$false] %s853_s26 }
  0x2e   : > { %715 = vmatprep.subr.mxu0 %v918_v0  ;;  %v471_v49 = vld [vmem:[%s1137_s5] sm:$0xff]  ;;  %s855_s25 = scalar_lea.vmem %s854_s26, 256 }
  0x2f   : > { %716 = vmatpush3.msra.mxu0 %v284_v5 }
  0x30   : > { %717 = vmatprep.subr.mxu0 %v918_v0 }
  0x31   : > { %718 = vmatpush3.msra.mxu0 %v283_v6 }
  0x32   : > { %719 = vmatprep.subr.mxu0 %v918_v0 }
  0x33   : > { %720 = vmatpush3.msra.mxu0 %v282_v7 }
  0x34   : > { %721 = vmatprep.subr.mxu0 %v918_v0 }
  0x35   : > { %722 = vmatpush3.msra.mxu0 %v281_v8 }
  0x36   : > { %723 = vmatprep.subr.mxu0 %v918_v0 }
  0x37   : > { %724 = vmatpush3.msra.mxu0 %v280_v9 }
  0x38   : > { %725 = vmatprep.subr.mxu0 %v918_v0 }
  0x39   : > { %726 = vmatpush3.msra.mxu0 %v279_v10 }
  0x3a   : > { %727 = vmatprep.subr.mxu0 %v918_v0 }
  0x3b   : > { %728 = vmatpush3.msra.mxu0 %v278_v11 }
  0x3c   : > { %729 = vmatprep.subr.mxu0 %v918_v0 }
  0x3d   : > { %730 = vmatpush3.msra.mxu0 %v277_v12 }
  0x3e   : > { %731 = vmatprep.subr.mxu0 %v918_v0 }
  0x3f   : > { %732 = vmatpush3.msra.mxu0 %v276_v13 }
  0x40   : > { %733 = vmatprep.subr.mxu0 %v918_v0 }
  0x41   : > { %734 = vmatpush3.msra.mxu0 %v275_v14 }
  0x42   : > { %735 = vmatprep.subr.mxu0 %v918_v0 }
  0x43   : > { %736 = vmatpush3.msra.mxu0 %v274_v15 }
  0x44   : > { %737 = vmatprep.subr.mxu0 %v918_v0 }
  0x45   : > { %738 = vmatpush3.msra.mxu0 %v273_v16 }
  0x46   : > { %740 = vmatmul.mubr.f32.vlgmr.msra.gmra.mxu0 %v272_v17 }
 0x106   : > { %v355_v19 = vpop.f32.mrf.mxu0 }
 0x107   : > { %743 = vmatpush3.msra.mxu1 %v355_v19 }
 0x108   : > { %v741_v20 = vpop.f32.mrf.mxu0  ;;  %745 = vmatmul.mubr.msk.f32.vlgmr.msra.gmra.mxu1 %vm363_vm1, %v359_v18  ;;  %753 = vmatprep.subr.mxu1 %v918_v0 }
 0x109   : > { %747 = vmatprep.mubr.msk.f32.mxu1 %vm919_vm0, %v918_v0 }
 0x10c   : > { %748 = vmatmul.mubr.msk.f32.gmra.mxu1 %vm363_vm1, %v360_v21 }
 0x10d   : > { %750 = vmatprep.mubr.msk.f32.mxu1 %vm919_vm0, %v918_v0 }
 0x110   : > { %751 = vmatmul.mubr.msk.f32.gmra.mxu1 %vm363_vm1, %v361_v22 }
 0x111   : > { %755 = vmatprep.mubr.msk.f32.mxu1 %vm919_vm0, %v918_v0 }
 0x1c8   : > { %v439_v24 = vpop.f32.mrf.mxu1 }
 0x1c9   : > { %453 = vrot.lane.b32.xlu0 %v439_v24, %s921_s13 }
 0x1ca   : > { %v746_v25 = vpop.f32.mrf.mxu1 }
 0x1cc   : > { %v444_v27 = vpop.f32.mrf.mxu1 }
 0x1cd   : > { %463 = vperm.xlu0 %821, %v362_v26  }
 0x1ce   : > { %v749_v28 = vpop.f32.mrf.mxu1 }
 0x1d0   : > { %v449_v29 = vpop.f32.mrf.mxu1 }
 0x1d1   : > { %455 = vrot.lane.b32.xlu1 %v449_v29, %s922_s16 }
 0x1d2   : > { %v752_v30 = vpop.f32.mrf.mxu1 }
 0x23b   : > { %v454_v34 = vpop.permute.xlu0 %453 }
 0x23c   : > { %v457_v35 = vmul.f32 %v670_v33, %v454_v34 }
 0x23e   : > { %v458_v38 = vadd.f32 %v457_v35, %v444_v27 }
 0x243   : > { %v456_v37 = vpop.permute.xlu1 %455 }
 0x244   : > { %v459_v39 = vmul.f32 %v671_v36, %v456_v37 }
 0x246   : > { %v460_v40 = vadd.f32 %v459_v39, %v458_v38 }
 0x248   : > { %v464_v41 = vpop.permute.xlu0 %463 }
 0x249   : > { %v466_v42 = vadd.f32 %v464_v41, %v460_v40 }
 0x24b   : > { %v467_v43 = vmax.f32 %v466_v42, 0.0 }
 0x24d   : > { %754 = vmatpush3.msra.mxu1 %v467_v43 }
 0x24e   : > { %756 = vmatmul.mubr.msk.f32.vlgmr.msra.gmra.mxu1 %vm363_vm1, %v468_v44 }
 0x24f   : > { %758 = vmatprep.mubr.msk.f32.mxu1 %vm919_vm0, %v918_v0 }
 0x252   : > { %759 = vmatmul.mubr.msk.f32.gmra.mxu1 %vm363_vm1, %v469_v45 }
 0x253   : > { %761 = vmatprep.mubr.msk.f32.mxu1 %vm919_vm0, %v918_v0 }
 0x256   : > { %762 = vmatmul.mubr.msk.f32.gmra.mxu1 %vm363_vm1, %v470_v46 }
 0x30e   : > { %v547_v47 = vpop.f32.mrf.mxu1 }
 0x30f   : > { %561 = vrot.lane.b32.xlu1 %v547_v47, %s921_s13  ;;  %s257_s13 = scalar_lea.vmem [#allocation5], %s668_s11 }
 0x310   : > { %v757_v48 = vpop.f32.mrf.mxu1  ;;  %s591_s14 = sshll.u32 %s257_s13, 4  ;;  %s592_s14 = int_to_ptr.vmem [resolvable:$true] %s591_s14 }
 0x311   : > { %s849_s19 = scalar_lea.vmem %s592_s14, 128  ;;  %p856_p11 = scmp.lt.s32.totalorder %s592_s14, %s854_s26 }
 0x312   : > { %v552_v50 = vpop.f32.mrf.mxu1  ;;  %p850_p8 = scmp.ne.s32.totalorder %s592_s14, %s849_s19  ;;  %p857_p12 = scmp.lt.s32.totalorder %s855_s25, %s849_s19 }
 0x313   : > { %571 = vperm.xlu1 %822, %v471_v49  }
 0x314   : > { %v760_v51 = vpop.f32.mrf.mxu1  ;;  %p851_p9 = pnand %p850_p8, %p997_p5  ;;  %p858_p13 = por %p857_p12, %p856_p11 }
 0x316   : > { %v557_v52 = vpop.f32.mrf.mxu1  ;;  %p852_p10 = pneg %p851_p9 }
 0x317   : > { %563 = vrot.lane.b32.xlu0 %v557_v52, %s922_s16  ;;  %s589_s16 = scalar_lea.hbm %s1138_s6, %s679_s12 }
 0x318   : > { %v763_v53 = vpop.f32.mrf.mxu1  ;;  %p859_p0 = pnand %p858_p13, %p852_p10 }
 0x381   : > { %v562_v54 = vpop.permute.xlu1 %561 }
 0x382   : > { %v565_v55 = vmul.f32 %v670_v33, %v562_v54 }
 0x384   : > { %v566_v57 = vadd.f32 %v565_v55, %v552_v50 }
 0x389   : > { %v564_v56 = vpop.permute.xlu0 %563 }
 0x38a   : > { %v567_v58 = vmul.f32 %v671_v36, %v564_v56 }
 0x38c   : > { %v568_v59 = vadd.f32 %v567_v58, %v566_v57 }
 0x38e   : > { %v572_v60 = vpop.permute.xlu1 %571 }
 0x38f   : > { %v574_v61 = vadd.f32 %v572_v60, %v568_v59 }
 0x391   : > { %v575_v62 = vmax.f32 %v574_v61, 0.0 }
 0x393   : > { %576 = vst [vmem:[%s257_s13] sm:$0xff] %v575_v62 }
 0x394   : > { %862 = shalt.err (!%p859_p0)
}
 0x395   : > { %s863_s28 = scalar_lea.hbm %s589_s16, 128  ;;  %s867_s10 = scalar_lea.hbm %s1138_s6, 256 }
 0x396   : > { %p864_p1 = scmp.ne.s32.totalorder %s589_s16, %s863_s28  ;;  %p868_p4 = scmp.lt.s32.totalorder %s589_s16, %s1138_s6 }
 0x397   : > { %p869_p7 = scmp.lt.s32.totalorder %s867_s10, %s863_s28 }
 0x398   : > { %p865_p2 = pnand %p864_p1, %p997_p5 }
 0x399   : > { %p870_p6 = por %p869_p7, %p868_p4 }
 0x39a   : > { %p866_p3 = pneg %p865_p2 }
 0x39c   : > { %p871_p8 = pnand %p870_p6, %p866_p3 }
 0x39e   : > { %874 = shalt.err (!%p871_p8)
}
 0x39f   : > { %768 = dma.vmem_to_hbm [thread:$0]  (%p997_p5), %s592_s14, 128, %s589_s16, %s578_s18  }
 0x3a0 PF: > { %p780_p9 = scmp.ge.s32.totalorder %s913_s24, 2  ;;  %s603_s13 = sand.u32 1, %s901_s21  }
 0x3a1   : > { %p1142_p10 = scmp.ne.s32.totalorder %s1140_s8, 0  ;;  %s604_s15 = scalar_lea.sflag [#allocation4], %s603_s13 }
 0x3a3   : > { %p775_p11 = pnand %p780_p9, %p1142_p10 }
 0x3a5   : > { %p776_p12 = pneg %p775_p11 }
 0x3a7   : > { %896 = dma.done.wait (%p776_p12), %s604_s15, 128  }
 0x3a8   : > { %898 = vsyncadd (%p776_p12), %s604_s15, 4294967168  ;;  %p17_p13 = scmp.ge.s32.totalorder %s984_s27, 4   ;;  %s1143_s21 = smov %s905_s22 }
 0x3a9   : > { %s1144_s22 = smov %s909_s23  ;;  %s1145_s23 = smov %s995_s30 }
 0x3aa   : > { %s1146_s24 = smov %s984_s27  ;;  %19 = sbr.rel (!%p17_p13) target bundleno = 4 (0x4), region = 84 }
 0x3af   :  { %609 = vsyncpa [#allocation3], 1 }
 0x3b0   :  { %611 = vsyncpa [#allocation3 + $0x1], 1 }
 0x3b1   :  { %612 = vsyncpa [#allocation4], 1 }
 0x3b2   :  { %614 = vsyncpa [#allocation4 + $0x1], 1 }

</bundles_post_ra>
